<compile_context>
chip_gen: v6e
topology: v6e:2x2x1
jax: 0.10.0
libtpu: 0.0.40
codegen_flags: <defaults>
</compile_context>

<pallas_src>
import functools

import jax
import jax.numpy as jnp
from jax.experimental import pallas as pl
from jax.experimental.pallas import tpu as pltpu


def _round_up(x, m):
    return ((x + m - 1) // m) * m


@functools.lru_cache(maxsize=None)
def _vmem_capacity_bytes():
    try:
        return int(pltpu.get_tpu_info().vmem_capacity_bytes)
    except Exception:
        return 64 * 1024 * 1024  # conservative (v7x per-TC VMEM)


def _ffn_kernel_f32out(x_ref, w1_ref, b1_ref, w2_ref, b2_ref, o_ref):
    """float32 output: accumulate partial products directly into o_ref."""
    # grid = (row_tiles, hidden_chunks); axis 1 is the reduction.
    k = pl.program_id(1)
    h = jnp.dot(x_ref[...], w1_ref[...], preferred_element_type=jnp.float32)
    h = jnp.maximum(h + b1_ref[...], 0.0)
    part = jnp.dot(h.astype(w2_ref.dtype), w2_ref[...],
                   preferred_element_type=jnp.float32)

    @pl.when(k == 0)
    def _():
        o_ref[...] = part + b2_ref[...]

    @pl.when(k > 0)
    def _():
        o_ref[...] += part
    # TODO(synk): training-mode dropout (stochastic mask) not applied; eval-mode identity.


def _ffn_kernel_acc(x_ref, w1_ref, b1_ref, w2_ref, b2_ref, o_ref, acc_ref):
    """Generic output dtype: f32 scratch accumulator, single cast at the end."""
    k = pl.program_id(1)

    @pl.when(k == 0)
    def _():
        acc_ref[...] = jnp.zeros_like(acc_ref)

    h = jnp.dot(x_ref[...], w1_ref[...], preferred_element_type=jnp.float32)
    h = jnp.maximum(h + b1_ref[...], 0.0)
    acc_ref[...] += jnp.dot(h.astype(w2_ref.dtype), w2_ref[...],
                            preferred_element_type=jnp.float32)

    @pl.when(k == pl.num_programs(1) - 1)
    def _():
        o_ref[...] = (acc_ref[...] + b2_ref[...]).astype(o_ref.dtype)


@functools.partial(jax.jit, static_argnames=("tile_m", "tile_h", "compute_dtype",
                                              "vmem_budget_bytes"))
def feed_forward(x, w1, b1, w2, b2, tile_m=512, tile_h=512,
                 compute_dtype=None, vmem_budget_bytes=None):
    """x: (B, T, E). w1: (E, 4E), b1: (1, 4E), w2: (4E, E), b2: (1, E)."""
    B, T, E = x.shape
    H = w1.shape[1]
    out_dtype = x.dtype

    # Optional low-precision matmul inputs (bf16 on v5e/v6e/v7x), f32 accumulation.
    # For production, pre-cast/store W1/W2 in compute_dtype OUTSIDE this call so
    # the astype below is a no-op instead of an extra per-call HBM pass.
    if compute_dtype is not None:
        x = x.astype(compute_dtype)
        w1 = w1.astype(compute_dtype)
        w2 = w2.astype(compute_dtype)
    b1 = b1.astype(jnp.float32)
    b2 = b2.astype(jnp.float32)

    M = B * T
    x2 = x.reshape(M, E)

    Ep = _round_up(E, 128)
    Hp = _round_up(H, 128)

    isz = jnp.dtype(x2.dtype).itemsize
    wsz = jnp.dtype(w1.dtype).itemsize
    osz = jnp.dtype(out_dtype).itemsize
    use_acc = jnp.dtype(out_dtype) != jnp.dtype(jnp.float32)

    # ---- Row tile (divisor-aware, low padding waste) ----
    if M <= tile_m:
        tm = max(8, _round_up(M, 8))
    else:
        base = max(128, (tile_m // 128) * 128)
        tm = None
        for cand in range(base, 127, -128):
            if (_round_up(M, cand) - M) * 8 <= M:       # <= ~12.5% pad waste
                tm = cand
                break
        if tm is None:
            tm = min(range(128, base + 1, 128),
                     key=lambda c: (_round_up(M, c) - M, -c))
    # Megacore (v7x has 2 TCs): prefer >=2 row tiles on the parallel axis when
    # splitting adds no extra padding.
    while tm > 128 and _round_up(M, tm) // tm < 2:
        half = max(128, _round_up((tm + 1) // 2, 8))
        if half >= tm or _round_up(M, half) > _round_up(M, tm):
            break
        tm = half

    # ---- VMEM budget & hidden-chunk tile ----
    cap = _vmem_capacity_bytes()
    budget = int(0.85 * cap)
    if vmem_budget_bytes is not None:
        budget = min(budget, int(vmem_budget_bytes))

    def footprint(tm_, th_):
        f = 2 * tm_ * Ep * isz                                  # x tile (double buffered)
        f += 2 * (Ep * th_ * wsz + th_ * 4 + th_ * Ep * wsz)    # W1, b1, W2
        f += 2 * Ep * 4                                         # b2
        f += 2 * tm_ * Ep * osz                                 # out tile
        if use_acc:
            f += tm_ * Ep * 4                                   # accumulator scratch
        f += tm_ * th_ * 4                                      # h intermediate
        return f

    if footprint(tm, Hp) <= budget:
        # Weights fully resident: constant index_map -> fetched once, reused
        # across every row tile (no per-row-tile HBM re-streaming of W1/W2).
        th = Hp
    else:
        th = 128
        for cand in range(min((tile_h // 128) * 128, Hp), 127, -128):
            if Hp % cand == 0 and footprint(tm, cand) <= budget:
                th = cand
                break
        while footprint(tm, th) > budget and tm > 128:
            tm = max(128, _round_up((tm + 1) // 2, 8))

    Mp = _round_up(M, tm)

    # ---- Zero padding (exact: padded embed/hidden columns contribute 0) ----
    if (Mp, Ep) != (M, E):
        x2 = jnp.pad(x2, ((0, Mp - M), (0, Ep - E)))
    if (Ep, Hp) != (E, H):
        w1 = jnp.pad(w1, ((0, Ep - E), (0, Hp - H)))
        b1 = jnp.pad(b1, ((0, 0), (0, Hp - H)))
        w2 = jnp.pad(w2, ((0, Hp - H), (0, Ep - E)))
        b2 = jnp.pad(b2, ((0, 0), (0, Ep - E)))

    grid = (Mp // tm, Hp // th)

    in_specs = [
        pl.BlockSpec((tm, Ep), lambda i, k: (i, 0)),   # x row tile (constant across k)
        pl.BlockSpec((Ep, th), lambda i, k: (0, k)),   # W1 hidden chunk
        pl.BlockSpec((1, th), lambda i, k: (0, k)),    # b1 hidden chunk
        pl.BlockSpec((th, Ep), lambda i, k: (k, 0)),   # W2 hidden chunk
        pl.BlockSpec((1, Ep), lambda i, k: (0, 0)),    # b2 (constant)
    ]
    out_spec = pl.BlockSpec((tm, Ep), lambda i, k: (i, 0))

    if use_acc:
        kernel = _ffn_kernel_acc
        scratch_shapes = [pltpu.VMEM((tm, Ep), jnp.float32)]
    else:
        kernel = _ffn_kernel_f32out
        scratch_shapes = []

    vmem_limit = max(int(0.85 * cap), 32 * 1024 * 1024)

    out2 = pl.pallas_call(
        kernel,
        out_shape=jax.ShapeDtypeStruct((Mp, Ep), out_dtype),
        grid_spec=pltpu.PrefetchScalarGridSpec(
            num_scalar_prefetch=0,
            grid=grid,
            in_specs=in_specs,
            out_specs=out_spec,
            scratch_shapes=scratch_shapes,
        ),
        compiler_params=pltpu.CompilerParams(
            dimension_semantics=("parallel", "arbitrary"),
            vmem_limit_bytes=vmem_limit,
        ),
    )(x2, w1, b1, w2, b2)

    if (Mp, Ep) != (M, E):
        out2 = out2[:M, :E]
    return out2.reshape(B, T, E)


def reference(x, w1, b1, w2, b2):
    h = jnp.maximum(x @ w1 + b1[0], 0.0)
    return h @ w2 + b2[0]


def reference_lowp(x, w1, b1, w2, b2, dtype):
    xc = x.astype(dtype)
    w1c = w1.astype(dtype)
    w2c = w2.astype(dtype)
    h = jnp.maximum(jnp.dot(xc, w1c, preferred_element_type=jnp.float32) + b1[0], 0.0)
    return jnp.dot(h.astype(dtype), w2c, preferred_element_type=jnp.float32) + b2[0]


def _make_params(key, n_embed):
    hidden = 4 * n_embed
    k1, k2, k3, k4 = jax.random.split(key, 4)
    lim1 = 1.0 / n_embed ** 0.5
    lim2 = 1.0 / hidden ** 0.5
    w1 = jax.random.uniform(k1, (n_embed, hidden), jnp.float32, -lim1, lim1)
    b1 = jax.random.uniform(k2, (1, hidden), jnp.float32, -lim1, lim1)
    w2 = jax.random.uniform(k3, (hidden, n_embed), jnp.float32, -lim2, lim2)
    b2 = jax.random.uniform(k4, (1, n_embed), jnp.float32, -lim2, lim2)
    return w1, b1, w2, b2


if __name__ == "__main__":
    key = jax.random.PRNGKey(0)
    k0, k1, kp0, kp1 = jax.random.split(key, 4)

    # Config 1: toy module config (n_embed=32); exercises E-padding to 128.
    n_embed, B, T = 32, 2, 8
    x = jax.random.normal(k0, (B, T, n_embed), dtype=jnp.float32)
    w1, b1, w2, b2 = _make_params(kp0, n_embed)
    out = feed_forward(x, w1, b1, w2, b2)
    jax.block_until_ready(out)
    ref = reference(x, w1, b1, w2, b2)
    assert out.shape == (B, T, n_embed)
    assert jnp.allclose(out, ref, atol=1e-5, rtol=1e-5), "mismatch vs reference (cfg1)"

    # Config 2: resident-weight path, odd row count (M=140 -> padded row tile).
    n_embed2, B2, T2 = 256, 2, 70
    x2 = jax.random.normal(k1, (B2, T2, n_embed2), dtype=jnp.float32)
    w1b, b1b, w2b, b2b = _make_params(kp1, n_embed2)
    out2 = feed_forward(x2, w1b, b1b, w2b, b2b)
    jax.block_until_ready(out2)
    ref2 = reference(x2, w1b, b1b, w2b, b2b)
    assert out2.shape == (B2, T2, n_embed2)
    assert jnp.allclose(out2, ref2, atol=1e-4, rtol=1e-4), "mismatch vs reference (cfg2)"

    # Config 3: forced streaming path — tiny VMEM budget drives hidden chunking
    # (th < H) plus >=2 row tiles on the parallel axis; f32 accumulation in o_ref.
    B3, T3 = 4, 128
    x3 = jax.random.normal(k0, (B3, T3, n_embed2), dtype=jnp.float32)
    out3 = feed_forward(x3, w1b, b1b, w2b, b2b, vmem_budget_bytes=2 * 1024 * 1024)
    jax.block_until_ready(out3)
    ref3 = reference(x3, w1b, b1b, w2b, b2b)
    assert jnp.allclose(out3, ref3, atol=1e-4, rtol=1e-4), "mismatch vs reference (cfg3)"

    # Config 4: recommended production path (v5e/v6e/v7x) — bf16 matmul inputs
    # with weights pre-cast ONCE outside the call, f32 accumulation inside.
    w1_bf = w1b.astype(jnp.bfloat16)
    w2_bf = w2b.astype(jnp.bfloat16)
    out4 = feed_forward(x2, w1_bf, b1b, w2_bf, b2b, compute_dtype=jnp.bfloat16)
    jax.block_until_ready(out4)
    ref4 = reference_lowp(x2, w1b, b1b, w2b, b2b, jnp.bfloat16)
    assert jnp.allclose(out4, ref4, atol=2e-2, rtol=2e-2), "mismatch vs reference (cfg4)"

    print("KERNEL_OK")
</pallas_src>

<mosaic_0001>
module attributes {stable_mosaic.version = 11 : i64} {
  func.func @_ffn_kernel_f32out(%arg0: i32, %arg1: i32, %arg2: memref<16x128xf32, #tpu.memory_space<vmem>>, %arg3: memref<128x128xf32, #tpu.memory_space<vmem>>, %arg4: memref<1x128xf32, #tpu.memory_space<vmem>>, %arg5: memref<128x128xf32, #tpu.memory_space<vmem>>, %arg6: memref<1x128xf32, #tpu.memory_space<vmem>>, %arg7: memref<16x128xf32, #tpu.memory_space<vmem>>) attributes {dimension_semantics = [#tpu.dimension_semantics<parallel>, #tpu.dimension_semantics<arbitrary>], iteration_bounds = array<i64: 1, 1>, scalar_prefetch = 0 : i64, scratch_operands = 0 : i64, tpu.core_type = #tpu.core_type<tc>, window_params = [{transform_indices = @transform_0, window_bounds = array<i64: 16, 128>}, {transform_indices = @transform_1, window_bounds = array<i64: 128, 128>}, {transform_indices = @transform_2, window_bounds = array<i64: 1, 128>}, {transform_indices = @transform_3, window_bounds = array<i64: 128, 128>}, {pipeline_mode = #tpu.pipeline_mode<synchronous>, transform_indices = @transform_4, window_bounds = array<i64: 1, 128>}, {transform_indices = @transform_5, window_bounds = array<i64: 16, 128>}]} {
    %c0 = arith.constant 0 : index
    %c0_0 = arith.constant 0 : index
    %0 = vector.load %arg2[%c0, %c0_0] : memref<16x128xf32, #tpu.memory_space<vmem>>, vector<16x128xf32>
    %c0_1 = arith.constant 0 : index
    %c0_2 = arith.constant 0 : index
    %1 = vector.load %arg3[%c0_1, %c0_2] : memref<128x128xf32, #tpu.memory_space<vmem>>, vector<128x128xf32>
    %cst = arith.constant dense<0.000000e+00> : vector<16x128xf32>
    %2 = tpu.matmul %0, %1, %cst {dimension_numbers = #tpu.dot_dimension_numbers<[1], [0], [0], [1], [0, 0, 1, 1], [], []>} : vector<16x128xf32>, vector<128x128xf32>, vector<16x128xf32> -> vector<16x128xf32>
    %c0_3 = arith.constant 0 : index
    %c0_4 = arith.constant 0 : index
    %3 = vector.load %arg4[%c0_3, %c0_4] : memref<1x128xf32, #tpu.memory_space<vmem>>, vector<1x128xf32>
    %4 = vector.broadcast %3 : vector<1x128xf32> to vector<16x128xf32>
    %5 = arith.addf %2, %4 : vector<16x128xf32>
    %cst_5 = arith.constant 0.000000e+00 : f32
    %6 = vector.broadcast %cst_5 : f32 to vector<16x128xf32>
    %7 = arith.maximumf %5, %6 : vector<16x128xf32>
    %c0_6 = arith.constant 0 : index
    %c0_7 = arith.constant 0 : index
    %8 = vector.load %arg5[%c0_6, %c0_7] : memref<128x128xf32, #tpu.memory_space<vmem>>, vector<128x128xf32>
    %cst_8 = arith.constant dense<0.000000e+00> : vector<16x128xf32>
    %9 = tpu.matmul %7, %8, %cst_8 {dimension_numbers = #tpu.dot_dimension_numbers<[1], [0], [0], [1], [0, 0, 1, 1], [], []>} : vector<16x128xf32>, vector<128x128xf32>, vector<16x128xf32> -> vector<16x128xf32>
    %c0_i32 = arith.constant 0 : i32
    %10 = arith.cmpi eq, %arg1, %c0_i32 : i32
    %11 = arith.extui %10 : i1 to i32
    %c0_i32_9 = arith.constant 0 : i32
    %12 = arith.cmpi ne, %11, %c0_i32_9 : i32
    scf.if %12 {
      %c0_12 = arith.constant 0 : index
      %c0_13 = arith.constant 0 : index
      %16 = vector.load %arg6[%c0_12, %c0_13] : memref<1x128xf32, #tpu.memory_space<vmem>>, vector<1x128xf32>
      %17 = vector.broadcast %16 : vector<1x128xf32> to vector<16x128xf32>
      %18 = arith.addf %9, %17 : vector<16x128xf32>
      %c0_14 = arith.constant 0 : index
      %c0_15 = arith.constant 0 : index
      %19 = vector.load %arg7[%c0_14, %c0_15] : memref<16x128xf32, #tpu.memory_space<vmem>>, vector<16x128xf32>
      tpu.vector_store %arg7[%c0_14, %c0_15], %18 {strides = array<i32>} : memref<16x128xf32, #tpu.memory_space<vmem>>, vector<16x128xf32>,
    } else {
    }
    %c0_i32_10 = arith.constant 0 : i32
    %13 = arith.cmpi sgt, %arg1, %c0_i32_10 : i32
    %14 = arith.extui %13 : i1 to i32
    %c0_i32_11 = arith.constant 0 : i32
    %15 = arith.cmpi ne, %14, %c0_i32_11 : i32
    scf.if %15 {
      %c0_12 = arith.constant 0 : index
      %c0_13 = arith.constant 0 : index
      %16 = vector.load %arg7[%c0_12, %c0_13] : memref<16x128xf32, #tpu.memory_space<vmem>>, vector<16x128xf32>
      %17 = arith.addf %16, %9 : vector<16x128xf32>
      %c0_14 = arith.constant 0 : index
      %c0_15 = arith.constant 0 : index
      %18 = vector.load %arg7[%c0_14, %c0_15] : memref<16x128xf32, #tpu.memory_space<vmem>>, vector<16x128xf32>
      tpu.vector_store %arg7[%c0_14, %c0_15], %17 {strides = array<i32>} : memref<16x128xf32, #tpu.memory_space<vmem>>, vector<16x128xf32>,
    } else {
    }
    return
  }
  func.func @transform_0(%arg0: i32, %arg1: i32) -> (i32, i32) {
    %c0_i32 = arith.constant 0 : i32
    %c0_i32_0 = arith.constant 0 : i32
    return %arg0, %c0_i32 : i32, i32
  }
  func.func @transform_1(%arg0: i32, %arg1: i32) -> (i32, i32) {
    %c0_i32 = arith.constant 0 : i32
    %c0_i32_0 = arith.constant 0 : i32
    return %c0_i32, %arg1 : i32, i32
  }
  func.func @transform_2(%arg0: i32, %arg1: i32) -> (i32, i32) {
    %c0_i32 = arith.constant 0 : i32
    %c0_i32_0 = arith.constant 0 : i32
    return %c0_i32, %arg1 : i32, i32
  }
  func.func @transform_3(%arg0: i32, %arg1: i32) -> (i32, i32) {
    %c0_i32 = arith.constant 0 : i32
    %c0_i32_0 = arith.constant 0 : i32
    return %arg1, %c0_i32 : i32, i32
  }
  func.func @transform_4(%arg0: i32, %arg1: i32) -> (i32, i32) {
    %c0_i32 = arith.constant 0 : i32
    %c0_i32_0 = arith.constant 0 : i32
    %c0_i32_1 = arith.constant 0 : i32
    return %c0_i32, %c0_i32_0 : i32, i32
  }
  func.func @transform_5(%arg0: i32, %arg1: i32) -> (i32, i32) {
    %c0_i32 = arith.constant 0 : i32
    %c0_i32_0 = arith.constant 0 : i32
    return %arg0, %c0_i32 : i32, i32
  }
}

</mosaic_0001>

<bundles_post_ra>
// kernel: feed_forward.1
= control target key start
LH: loop header
LB: loop body
LE: loop exit
PB: predicated region body
PF: predicated region fallthrough
CT: control target
= control target key end

     0   :  { %s494_s1 = inlined_call_operand.vmem [shape: f32[128,128], index: 1, kind: input, shape index: {}]   ;;  %s495_s0 = inlined_call_operand.vmem [shape: f32[16,128], index: 0, kind: input, shape index: {}]   ;;  %s496_s3 = inlined_call_operand.vmem [shape: f32[128,128], index: 3, kind: input, shape index: {}]   ;;  %s497_s2 = inlined_call_operand.vmem [shape: f32[1,128], index: 2, kind: input, shape index: {}]   ;;  %s498_s4 = inlined_call_operand.vmem [shape: f32[1,128], index: 4, kind: input, shape index: {}]   ;;  %s499_s5 = inlined_call_operand.vmem [shape: f32[16,128], index: 5, kind: output, shape index: {}]  }
   0x1   :  { %v37_v0 = vld [vmem:[%s494_s1 + $0x78] sm:$0xff]  ;;  %v36_v1 = vld [vmem:[%s494_s1 + $0x70] sm:$0xff]  ;;  %v35_v2 = vld [vmem:[%s494_s1 + $0x68] sm:$0xff] }
   0x2   :  { %280 = vmatprep.subr.mxu0 %v37_v0  ;;  %v34_v3 = vld [vmem:[%s494_s1 + $0x60] sm:$0xff]  ;;  %v33_v5 = vld [vmem:[%s494_s1 + $0x58] sm:$0xff]  ;;  %v136_v7 = vld [vmem:[%s496_s3 + $0x70] sm:$0xff] }
   0x3   :  { %281 = vmatpush3.msra.mxu0 %v37_v0  ;;  %v20_v4 = vld [vmem:[%s495_s0] sm:$0xff]  ;;  %v137_v6 = vld [vmem:[%s496_s3 + $0x78] sm:$0xff]  ;;  %v32_v8 = vld [vmem:[%s494_s1 + $0x50] sm:$0xff] }
   0x4   :  { %282 = vmatprep.subr.mxu0 %v36_v1  ;;  %312 = vmatprep.mubr.f32.mxu0 %v20_v4  ;;  %v135_v9 = vld [vmem:[%s496_s3 + $0x68] sm:$0xff]  ;;  %v134_v11 = vld [vmem:[%s496_s3 + $0x60] sm:$0xff]  ;;  %v133_v13 = vld [vmem:[%s496_s3 + $0x58] sm:$0xff] }
   0x5   :  { %283 = vmatpush3.msra.mxu0 %v36_v1  ;;  %315 = vmatprep.subr.mxu1 %v137_v6  ;;  %v31_v10 = vld [vmem:[%s494_s1 + $0x48] sm:$0xff]  ;;  %v30_v12 = vld [vmem:[%s494_s1 + $0x40] sm:$0xff]  ;;  %v29_v14 = vld [vmem:[%s494_s1 + $0x38] sm:$0xff] }
   0x6   :  { %284 = vmatprep.subr.mxu0 %v35_v2  ;;  %316 = vmatpush3.msra.mxu1 %v137_v6  ;;  %v132_v15 = vld [vmem:[%s496_s3 + $0x50] sm:$0xff]  ;;  %v131_v17 = vld [vmem:[%s496_s3 + $0x48] sm:$0xff]  ;;  %v130_v19 = vld [vmem:[%s496_s3 + $0x40] sm:$0xff] }
   0x7   :  { %285 = vmatpush3.msra.mxu0 %v35_v2  ;;  %317 = vmatprep.subr.mxu1 %v136_v7  ;;  %v28_v16 = vld [vmem:[%s494_s1 + $0x30] sm:$0xff]  ;;  %v27_v18 = vld [vmem:[%s494_s1 + $0x28] sm:$0xff]  ;;  %v26_v20 = vld [vmem:[%s494_s1 + $0x20] sm:$0xff] }
   0x8   :  { %286 = vmatprep.subr.mxu0 %v34_v3  ;;  %318 = vmatpush3.msra.mxu1 %v136_v7  ;;  %v129_v21 = vld [vmem:[%s496_s3 + $0x38] sm:$0xff]  ;;  %v128_v23 = vld [vmem:[%s496_s3 + $0x30] sm:$0xff]  ;;  %v127_v25 = vld [vmem:[%s496_s3 + $0x28] sm:$0xff] }
   0x9   :  { %287 = vmatpush3.msra.mxu0 %v34_v3  ;;  %319 = vmatprep.subr.mxu1 %v135_v9  ;;  %v25_v22 = vld [vmem:[%s494_s1 + $0x18] sm:$0xff]  ;;  %v24_v24 = vld [vmem:[%s494_s1 + $0x10] sm:$0xff]  ;;  %v23_v26 = vld [vmem:[%s494_s1 + $0x8] sm:$0xff] }
   0xa   :  { %288 = vmatprep.subr.mxu0 %v33_v5  ;;  %320 = vmatpush3.msra.mxu1 %v135_v9  ;;  %v126_v27 = vld [vmem:[%s496_s3 + $0x20] sm:$0xff]  ;;  %v21_v29 = vld [vmem:[%s495_s0 + $0x8] sm:$0xff]  ;;  %v125_v30 = vld [vmem:[%s496_s3 + $0x18] sm:$0xff] }
   0xb   :  { %289 = vmatpush3.msra.mxu0 %v33_v5  ;;  %321 = vmatprep.subr.mxu1 %v134_v11  ;;  %v22_v28 = vld [vmem:[%s494_s1] sm:$0xff]  ;;  %v124_v31 = vld [vmem:[%s496_s3 + $0x10] sm:$0xff]  ;;  %v123_v32 = vld [vmem:[%s496_s3 + $0x8] sm:$0xff] }
   0xc   :  { %290 = vmatprep.subr.mxu0 %v32_v8  ;;  %322 = vmatpush3.msra.mxu1 %v134_v11  ;;  %v122_v33 = vld [vmem:[%s496_s3] sm:$0xff] }
   0xd   :  { %291 = vmatpush3.msra.mxu0 %v32_v8  ;;  %323 = vmatprep.subr.mxu1 %v133_v13  ;;  %v242_v34 = vld [vmem:[%s497_s2] ss:$0 sm:$0xff] }
   0xe   :  { %292 = vmatprep.subr.mxu0 %v31_v10  ;;  %324 = vmatpush3.msra.mxu1 %v133_v13  ;;  %v243_v41 = vld [vmem:[%s498_s4] ss:$0 sm:$0xff] }
   0xf   :  { %293 = vmatpush3.msra.mxu0 %v31_v10  ;;  %325 = vmatprep.subr.mxu1 %v132_v15 }
  0x10   :  { %294 = vmatprep.subr.mxu0 %v30_v12  ;;  %326 = vmatpush3.msra.mxu1 %v132_v15 }
  0x11   :  { %295 = vmatpush3.msra.mxu0 %v30_v12  ;;  %327 = vmatprep.subr.mxu1 %v131_v17 }
  0x12   :  { %296 = vmatprep.subr.mxu0 %v29_v14  ;;  %328 = vmatpush3.msra.mxu1 %v131_v17 }
  0x13   :  { %297 = vmatpush3.msra.mxu0 %v29_v14  ;;  %329 = vmatprep.subr.mxu1 %v130_v19 }
  0x14   :  { %298 = vmatprep.subr.mxu0 %v28_v16  ;;  %330 = vmatpush3.msra.mxu1 %v130_v19 }
  0x15   :  { %299 = vmatpush3.msra.mxu0 %v28_v16  ;;  %331 = vmatprep.subr.mxu1 %v129_v21 }
  0x16   :  { %300 = vmatprep.subr.mxu0 %v27_v18  ;;  %332 = vmatpush3.msra.mxu1 %v129_v21 }
  0x17   :  { %301 = vmatpush3.msra.mxu0 %v27_v18  ;;  %333 = vmatprep.subr.mxu1 %v128_v23 }
  0x18   :  { %302 = vmatprep.subr.mxu0 %v26_v20  ;;  %334 = vmatpush3.msra.mxu1 %v128_v23 }
  0x19   :  { %303 = vmatpush3.msra.mxu0 %v26_v20  ;;  %335 = vmatprep.subr.mxu1 %v127_v25 }
  0x1a   :  { %304 = vmatprep.subr.mxu0 %v25_v22  ;;  %336 = vmatpush3.msra.mxu1 %v127_v25 }
  0x1b   :  { %305 = vmatpush3.msra.mxu0 %v25_v22  ;;  %337 = vmatprep.subr.mxu1 %v126_v27 }
  0x1c   :  { %306 = vmatprep.subr.mxu0 %v24_v24  ;;  %338 = vmatpush3.msra.mxu1 %v126_v27 }
  0x1d   :  { %307 = vmatpush3.msra.mxu0 %v24_v24  ;;  %339 = vmatprep.subr.mxu1 %v125_v30 }
  0x1e   :  { %308 = vmatprep.subr.mxu0 %v23_v26  ;;  %340 = vmatpush3.msra.mxu1 %v125_v30 }
  0x1f   :  { %309 = vmatpush3.msra.mxu0 %v23_v26  ;;  %341 = vmatprep.subr.mxu1 %v124_v31 }
  0x20   :  { %310 = vmatprep.subr.mxu0 %v22_v28  ;;  %342 = vmatpush3.msra.mxu1 %v124_v31 }
  0x21   :  { %311 = vmatpush3.msra.mxu0 %v22_v28  ;;  %343 = vmatprep.subr.mxu1 %v123_v32 }
  0x22   :  { %313 = vmatmul.mubr.f32.vlgmr.msra.gmra.mxu0 %v21_v29  ;;  %344 = vmatpush3.msra.mxu1 %v123_v32 }
  0x23   :  { %345 = vmatprep.subr.mxu1 %v122_v33 }
  0x24   :  { %346 = vmatpush3.msra.mxu1 %v122_v33 }
  0xe2   :  { %v314_v35 = vpop.f32.mrf.mxu0 }
  0xe3   :  { %v117_v36 = vadd.f32 %v314_v35, %v242_v34 }
  0xe4   :  { %v111_v37 = vpop.f32.mrf.mxu0 }
  0xe5   :  { %v112_v38 = vadd.f32 %v242_v34, %v111_v37  ;;  %v121_v40 = vmax.f32 %v117_v36, 0.0 }
  0xe7   :  { %v120_v39 = vmax.f32 %v112_v38, 0.0 }
  0xe9   :  { %347 = vmatprep.mubr.f32.mxu1 %v120_v39 }
  0xea   :  { %348 = vmatmul.mubr.f32.vlgmr.msra.gmra.mxu1 %v121_v40 }
 0x1aa   :  { %v349_v42 = vpop.f32.mrf.mxu1 }
 0x1ab   :  { %v225_v43 = vadd.f32 %v349_v42, %v243_v41 }
 0x1ac   :  { %v204_v44 = vpop.f32.mrf.mxu1 }
 0x1ad   :  { %227 = vst [vmem:[%s499_s5 + $0x8] sm:$0xff] %v225_v43  ;;  %v224_v45 = vadd.f32 %v243_v41, %v204_v44 }
 0x1af   :  { %226 = vst [vmem:[%s499_s5] sm:$0xff] %v224_v45 }

</bundles_post_ra>
